<compile_context>
chip_gen: v7x
topology: tpu7x:2x2x1
jax: 0.10.0
libtpu: 0.0.40
codegen_flags: <defaults>
</compile_context>

<pallas_src>
import jax
import jax.numpy as jnp
import numpy as np
from jax.experimental import pallas as pl
from jax.experimental.pallas import tpu as pltpu


def _make_upsample_kernel(s, cw, n_chunks, use_highest):
    precision = jax.lax.Precision.HIGHEST if use_highest else None

    def kernel(r_ref, x_ref, o_ref):
        tb, th, tw = x_ref.shape
        r = r_ref[...]
        # Static loop over lane chunks (chunk boundaries are 128-multiples or
        # the full width, so every slice is tile-aligned and every store is
        # lane-dense).
        for j in range(n_chunks):
            x2 = x_ref[:, :, j * cw:(j + 1) * cw].reshape(tb * th, cw)
            # Width (lane) replication on the MXU.  R is a 0/1 selector, so
            # the matmul is an exact copy in any accumulation dtype; for f32,
            # HIGHEST precision guarantees no bf16 operand truncation.
            y2 = jnp.dot(
                x2, r,
                preferred_element_type=o_ref.dtype,
                precision=precision,
            )
            # Height (sublane) replication: broadcast + reshape, no MXU work.
            y = y2.reshape(tb, th, 1, cw * s)
            y = jnp.broadcast_to(y, (tb, th, s, cw * s))
            o_ref[:, :, j * cw * s:(j + 1) * cw * s] = y.reshape(
                tb, th * s, cw * s
            )

    return kernel


def _device_profile():
    """Generation-aware tile/VMEM budgets."""
    kind = ""
    try:
        kind = jax.devices()[0].device_kind.lower()
    except Exception:
        pass
    vmem_cap = None
    try:
        vmem_cap = int(pltpu.get_tpu_info().vmem_capacity_bytes)
    except Exception:
        vmem_cap = None
    small_vmem = (vmem_cap is not None and vmem_cap <= (64 << 20)) or ("7" in kind)
    if small_vmem:
        # v7x-class: 64 MiB VMEM per TensorCore, 2 cores -> smaller tiles and
        # an even, >=4 step count for balanced megacore occupancy.
        return {"max_tile": 4 << 20, "vmem_limit": 44 << 20,
                "min_steps": 4, "even_steps": True}
    # v5e / v6e: 128 MiB VMEM -> fat tiles to amortize ~0.35 us/step overhead.
    return {"max_tile": 8 << 20, "vmem_limit": 64 << 20,
            "min_steps": 2, "even_steps": False}


def _divisors_desc(n):
    return [d for d in range(n, 0, -1) if n % d == 0]


def _choose_tiles(nc, h, w, s, itemsize, sub, max_tile, min_steps, even_steps):
    """Pick (TB, TH, TW).

    Constraints (lane/sublane rules):
      * TW is a multiple of 128 and divides W, or TW == W
      * TH is a multiple of `sub` (8 f32 / 16 bf16) and divides H, or TH == H
      * TB divides N*C
    Target: per-step output tile of roughly `max_tile` bytes, full-W blocks
    preferred (row-contiguous DMAs), and a grid-step count that satisfies the
    megacore constraints when possible.
    """
    def out_bytes(tb, th, tw):
        return tb * (th * s) * (tw * s) * itemsize

    th_cands = [d for d in _divisors_desc(h) if d == h or d % sub == 0]
    th_min = th_cands[-1]

    # Width: keep full W (contiguous rows) unless even a minimal-height slab
    # blows the budget; then fall back to 128-multiple divisors of W.
    tw = w
    if out_bytes(1, th_min, w) > max_tile:
        for d in _divisors_desc(w):
            if d % 128 == 0 and out_bytes(1, th_min, d) <= max_tile:
                tw = d
                break
        # If no 128-multiple divisor fits, keep TW = W; the caller raises the
        # VMEM limit to cover the overshoot.

    # Height: largest dtype-aligned divisor (or full H) under the budget.
    th = th_cands[-1]
    for d in th_cands:
        if out_bytes(1, d, tw) <= max_tile:
            th = d
            break

    # Channel batch: biggest fused (n, c) batch under the budget that keeps a
    # friendly total step count; relax the step constraint for tiny problems.
    spatial_steps = (h // th) * (w // tw)

    def ok_steps(steps):
        if steps < min_steps:
            return False
        if even_steps and steps % 2:
            return False
        return True

    tb = None
    for cand in _divisors_desc(nc):
        if out_bytes(cand, th, tw) > max_tile:
            continue
        if ok_steps((nc // cand) * spatial_steps):
            tb = cand
            break
    if tb is None:
        tb = 1
        for cand in _divisors_desc(nc):
            if out_bytes(cand, th, tw) <= max_tile:
                tb = cand
                break

    return tb, th, tw


def _choose_chunk(tw, dtype):
    """In-kernel matmul chunk width: bounds MXU K so the kernel stays HBM-bound."""
    if tw % 128:
        return tw                       # single chunk (full, non-128 width)
    pref = 256 if dtype == jnp.bfloat16 else 128
    for cand in (pref, 128):
        if tw % cand == 0:
            return cand
    return tw


def upsample_nearest(x, scale_factor=2, size=None):
    """Equivalent of F.upsample_nearest(x, size=None, scale_factor=s) for NCHW."""
    # TODO(synk): `size=` path (arbitrary target size) not implemented; the
    # module's default config uses scale_factor=2, size=None.
    assert size is None, "only the scale_factor path is implemented"
    s = int(scale_factor)
    if s != scale_factor or s < 1:
        # TODO(synk): fractional scale factors not implemented.
        raise NotImplementedError("only integer scale factors are supported")
    if jnp.dtype(x.dtype) not in (jnp.dtype(jnp.float32), jnp.dtype(jnp.bfloat16)):
        # TODO(synk): other dtypes (f64 / f16 / ints) would need their own
        # exact replication path; the generator only upsamples f32/bf16.
        raise NotImplementedError("only float32 / bfloat16 inputs are supported")
    if s == 1:
        return x

    N, C, H, W = x.shape
    Ho, Wo = H * s, W * s
    nc = N * C
    itemsize = jnp.dtype(x.dtype).itemsize
    sub = 16 if x.dtype == jnp.bfloat16 else 8

    prof = _device_profile()
    tb, th, tw = _choose_tiles(
        nc, H, W, s, itemsize, sub,
        prof["max_tile"], prof["min_steps"], prof["even_steps"],
    )
    cw = _choose_chunk(tw, x.dtype)
    n_chunks = tw // cw
    grid = (nc // tb, H // th, W // tw)

    # Chunk-local 0/1 column-replication matrix (replication is shift-invariant,
    # so the same (cw, cw*s) matrix serves every chunk of every tile).  Built
    # in x.dtype so the MXU runs the fast path; result is still exact.
    R = (jnp.arange(cw)[:, None] == (jnp.arange(cw * s)[None, :] // s)).astype(x.dtype)
    # TODO(synk): R could be single-buffered (pl.Buffered(1)); its constant
    # index_map already avoids re-DMA, so the double buffer costs only ~KiBs.

    # VMEM budget: double-buffered in/out blocks + R + per-chunk intermediates.
    in_block = tb * th * tw * itemsize
    out_block = in_block * s * s
    need = (2 * (in_block + out_block)
            + 2 * (out_block // max(n_chunks, 1))
            + 2 * cw * cw * s * itemsize
            + (8 << 20))
    vmem_limit = int(max(prof["vmem_limit"], min(need, 128 << 20)))

    x3 = x.reshape(nc, H, W)  # free reshape (contiguous merge of N, C)

    out3 = pl.pallas_call(
        _make_upsample_kernel(s, cw, n_chunks, use_highest=(x.dtype == jnp.float32)),
        out_shape=jax.ShapeDtypeStruct((nc, Ho, Wo), x.dtype),
        grid_spec=pltpu.PrefetchScalarGridSpec(
            num_scalar_prefetch=0,
            grid=grid,
            in_specs=[
                pl.BlockSpec((cw, cw * s), lambda b, i, j: (0, 0)),      # R (shared)
                pl.BlockSpec((tb, th, tw), lambda b, i, j: (b, i, j)),   # x tile
            ],
            out_specs=pl.BlockSpec(
                (tb, th * s, tw * s), lambda b, i, j: (b, i, j)
            ),
        ),
        compiler_params=pltpu.CompilerParams(
            dimension_semantics=("parallel", "parallel", "parallel"),
            vmem_limit_bytes=vmem_limit,
        ),
    )(R, x3)

    return out3.reshape(N, C, Ho, Wo)


if __name__ == "__main__":
    key = jax.random.PRNGKey(0)
    x = jax.random.normal(key, (2, 4, 16, 16), dtype=jnp.float32)

    out = jax.block_until_ready(upsample_nearest(x, scale_factor=2))

    # Reference (plain JAX) nearest-neighbor upsample for verification.
    ref = jnp.repeat(jnp.repeat(x, 2, axis=2), 2, axis=3)
    assert out.shape == (2, 4, 32, 32), out.shape
    np.testing.assert_allclose(np.asarray(out), np.asarray(ref), rtol=0, atol=0)

    # bf16 path (operands and MXU accumulation stay in bf16; still bit-exact).
    xb = x.astype(jnp.bfloat16)
    outb = jax.block_until_ready(upsample_nearest(xb, scale_factor=2))
    refb = jnp.repeat(jnp.repeat(xb, 2, axis=2), 2, axis=3)
    np.testing.assert_allclose(
        np.asarray(outb.astype(jnp.float32)),
        np.asarray(refb.astype(jnp.float32)),
        rtol=0, atol=0,
    )

    print("KERNEL_OK")
</pallas_src>

<mosaic_0001>
module attributes {stable_mosaic.version = 11 : i64} {
  func.func @kernel(%arg0: i32, %arg1: i32, %arg2: i32, %arg3: memref<16x32xf32, #tpu.memory_space<vmem>>, %arg4: memref<4x16x16xf32, #tpu.memory_space<vmem>>, %arg5: memref<4x32x32xf32, #tpu.memory_space<vmem>>) attributes {dimension_semantics = [#tpu.dimension_semantics<parallel>, #tpu.dimension_semantics<parallel>, #tpu.dimension_semantics<parallel>], iteration_bounds = array<i64: 2, 1, 1>, scalar_prefetch = 0 : i64, scratch_operands = 0 : i64, tpu.core_type = #tpu.core_type<tc>, window_params = [{pipeline_mode = #tpu.pipeline_mode<synchronous>, transform_indices = @transform_0, window_bounds = array<i64: 16, 32>}, {transform_indices = @transform_1, window_bounds = array<i64: 4, 16, 16>}, {transform_indices = @transform_2, window_bounds = array<i64: 4, 32, 32>}]} {
    %c0 = arith.constant 0 : index
    %c0_0 = arith.constant 0 : index
    %0 = vector.load %arg3[%c0, %c0_0] : memref<16x32xf32, #tpu.memory_space<vmem>>, vector<16x32xf32>
    %c0_1 = arith.constant 0 : index
    %c0_2 = arith.constant 0 : index
    %c0_3 = arith.constant 0 : index
    %1 = vector.load %arg4[%c0_1, %c0_2, %c0_3] : memref<4x16x16xf32, #tpu.memory_space<vmem>>, vector<4x16x16xf32>
    %2 = vector.shape_cast %1 : vector<4x16x16xf32> to vector<64x16xf32>
    %cst = arith.constant dense<0.000000e+00> : vector<64x32xf32>
    %3 = tpu.matmul %2, %0, %cst {dimension_numbers = #tpu.dot_dimension_numbers<[1], [0], [0], [1], [0, 0, 1, 1], [], []>, precision = #tpu.contract_precision<fp32>} : vector<64x16xf32>, vector<16x32xf32>, vector<64x32xf32> -> vector<64x32xf32>
    %4 = vector.shape_cast %3 : vector<64x32xf32> to vector<4x16x1x32xf32>
    %5 = vector.shape_cast %4 : vector<4x16x1x32xf32> to vector<4x16x1x32xf32>
    %6 = vector.broadcast %5 : vector<4x16x1x32xf32> to vector<4x16x2x32xf32>
    %7 = vector.shape_cast %6 : vector<4x16x2x32xf32> to vector<4x32x32xf32>
    %c0_4 = arith.constant 0 : index
    %c0_5 = arith.constant 0 : index
    %c0_6 = arith.constant 0 : index
    %8 = vector.load %arg5[%c0_4, %c0_5, %c0_6] : memref<4x32x32xf32, #tpu.memory_space<vmem>>, vector<4x32x32xf32>
    tpu.vector_store %arg5[%c0_4, %c0_5, %c0_6], %7 {strides = array<i32>} : memref<4x32x32xf32, #tpu.memory_space<vmem>>, vector<4x32x32xf32>,
    return
  }
  func.func @transform_0(%arg0: i32, %arg1: i32, %arg2: i32) -> (i32, i32) {
    %c0_i32 = arith.constant 0 : i32
    %c0_i32_0 = arith.constant 0 : i32
    %c0_i32_1 = arith.constant 0 : i32
    return %c0_i32, %c0_i32_0 : i32, i32
  }
  func.func @transform_1(%arg0: i32, %arg1: i32, %arg2: i32) -> (i32, i32, i32) {
    %c0_i32 = arith.constant 0 : i32
    return %arg0, %arg1, %arg2 : i32, i32, i32
  }
  func.func @transform_2(%arg0: i32, %arg1: i32, %arg2: i32) -> (i32, i32, i32) {
    %c0_i32 = arith.constant 0 : i32
    return %arg0, %arg1, %arg2 : i32, i32, i32
  }
}

</mosaic_0001>

<bundles_post_ra>
// kernel: tpu_custom_call.1
= control target key start
LH: loop header
LB: loop body
LE: loop exit
PB: predicated region body
PF: predicated region fallthrough
CT: control target
= control target key end

     0   :  { %7 = vsyncpa [#allocation3], 0  ;;  %s3124_s0 = inlined_call_operand.hbm [shape: f32[16,32], index: 0, kind: input, shape index: {}]   ;;  %s3125_s1 = inlined_call_operand.hbm [shape: f32[8,16,16], index: 1, kind: input, shape index: {}]   ;;  %s3126_s2 = inlined_call_operand.hbm [shape: f32[8,32,32], index: 2, kind: output, shape index: {}]  }
   0x1   :  { %8 = vsyncpa [#allocation6], 0 }
   0x2   :  { %10 = vsyncpa [#allocation6 + $0x1], 0 }
   0x3   :  { %11 = vsyncpa [#allocation4], 0 }
   0x4   :  { %13 = vsyncpa [#allocation4 + $0x1], 0  ;;  %s2582_s9 = smov 0   ;;  %s2584_s10 = smov 0  }
   0x5   :  { %s2586_s11 = smov 0   ;;  %s2588_s12 = smov 0  }
   0x6   :  { %s2590_s13 = smov 0   ;;  %s2592_s14 = smov 0  }
   0x7 LB: > { %s2090_s15 = sadd.s32 4294967295, %s2556_s14   ;;  %s2091_s16 = sadd.s32 4294967294, %s2556_s14   ;;  %s2556_s14 = sphi %s2592_s14, %s19_s14   ;;  %s2552_s13 = sphi %s2590_s13, %s3150_s13   ;;  %s2548_s12 = sphi %s2588_s12, %s3149_s12   ;;  %s2544_s11 = sphi %s2586_s11, %s3148_s11   ;;  %s2540_s10 = sphi %s2584_s10, %s3147_s10   ;;  %s2536_s9 = sphi %s2582_s9, %s3146_s9  }
   0x8   : > { %p83_p0 = scmp.ne.s32.totalorder %s2540_s10, %s2536_s9  ;;  %p2616_p1 = scmp.eq.s32.totalorder %s2090_s15, 0 }
   0x9   : > { %p2620_p2 = scmp.eq.s32.totalorder %s2090_s15, 1  ;;  %p117_p3 = scmp.eq.s32.totalorder %s2091_s16, 1 }
   0xa   : > { %s3131_s17 = scalar_select %p2616_p1, 1, 0 }
   0xb   : > { %s3132_s18 = scalar_select %p2620_p2, 1, 0 }
   0xc   : > { %p2626_p4 = por %p2616_p1, %p83_p0  ;;  %p2092_p5 = scmp.ge.s32.totalorder %s2556_s14, 1 }
   0xd   : > { %p2631_p6 = por %p117_p3, %p83_p0  ;;  %p124_p7 = scmp.lt.s32.totalorder %s2556_s14, 3 }
   0xe   : > { %s3133_s19 = scalar_select %p2626_p4, 1, 0 }
   0xf   : > { %s3134_s20 = scalar_select %p2631_p6, 1, 0 }
  0x10   : > { %p2636_p8 = pnand %p2092_p5, %p124_p7  ;;  %s2558_s22 = smov [#allocation2]  }
  0x11   : > { %s136_s23 = sshll.u32 %s2558_s22, 4  ;;  %s38_s25 = sadd.s32 1, %s2552_s13  ;;  %s137_s23 = int_to_ptr.vmem [resolvable:$true] %s136_s23 }
  0x12   : > { %s3135_s21 = scalar_select %p2636_p8, 1, 0 }
  0x13   : > { %p2341_p9 = pneg %p2636_p8  ;;  %s2412_s28 = scalar_lea.hbm %s3124_s0, 256 }
  0x14   : > { %p2413_p12 = scmp.ne.s32.totalorder %s3124_s0, %s2412_s28  ;;  %p2419_p5 = scmp.lt.u32.totalorder %s2412_s28, %s3124_s0 }
  0x15   : > { %p2645_p11 = pnand %p2341_p9, %p2616_p1 }
  0x17   : > { %p2414_p13 = pneg %p2645_p11 }
  0x19   : > { %p2415_p0 = pnand %p2414_p13, %p2413_p12 }
  0x1b   : > { %p2416_p3 = pneg %p2415_p0 }
  0x1d   : > { %p2421_p7 = pnand %p2419_p5, %p2416_p3 }
  0x1f   : > { %2424 = shalt.err (!%p2421_p7)
}
  0x20   : > { %s2425_s5 = scalar_lea.vmem %s137_s23, 256  ;;  %p2433_p4 = scmp.lt.s32.totalorder %s137_s23, %s137_s23 }
  0x21   : > { %p2426_p9 = scmp.ne.s32.totalorder %s137_s23, %s2425_s5  ;;  %p2434_p1 = scmp.lt.s32.totalorder %s2425_s5, %s2425_s5 }
  0x23   : > { %p2428_p10 = pnand %p2426_p9, %p2414_p13  ;;  %p2435_p8 = por %p2434_p1, %p2433_p4 }
  0x25   : > { %p2429_p6 = pneg %p2428_p10 }
  0x27   : > { %p2436_p2 = pnand %p2435_p8, %p2429_p6 }
  0x29   : > { %2439 = shalt.err (!%p2436_p2)
}
  0x2a   : > { %s2559_s6 = smov 128   ;;  %s2560_s7 = smov 8  }
  0x2b   : > { %2344 = dma.hbm_to_vmem [thread:$0]  (!%p2645_p11), %s3124_s0, 256, %s137_s23, [#allocation3], %s2559_s6, %s2559_s6, %s2560_s7  }
  0x2c   : > { %p40_p1 = scmp.ge.s32.totalorder %s38_s25, 2  ;;  %s70_s16 = sadd.s32 1, %s2544_s11 }
  0x2d   : > { %p77_p2 = scmp.ne.s32.totalorder %s2544_s11, %s2540_s10  ;;  %p78_p4 = scmp.eq.s32.totalorder %s2556_s14, 0 }
  0x2e   : > { %s3152_s25 = smov (%p40_p1, %s38_s25), 0  ;;  %p3138_p8 = scmp.ne.s32.totalorder %s3132_s18, 0 }
  0x2f   : > { %p2675_p6 = por %p78_p4, %p77_p2  ;;  %s63_s26 = ssub.s32 %s2552_s13, %s3152_s25 }
  0x30   : > { %p2681_p10 = por %p3138_p8, %p77_p2  ;;  %p2354_p12 = scmp.lt.s32.totalorder %s2556_s14, 2 }
  0x31   : > { %p68_p11 = scmp.eq.s32.totalorder %s63_s26, 0  ;;  %s150_s23 = sand.u32 1, %s2544_s11  }
  0x32   : > { %s2095_s27 = sshll.u32 %s150_s23, 6  ;;  %s2110_s29 = sshll.u32 %s2552_s13, 10 }
  0x33   : > { %s2690_s28 = scalar_select %p68_p11, %s2544_s11, %s70_s16  }
  0x34   : > { %s2696_s4 = scalar_lea.hbm %s3125_s1, %s2110_s29  ;;  %s154_s18 = scalar_lea.vmem [#allocation5], %s2095_s27 }
  0x35   : > { %s165_s5 = sshll.u32 %s154_s18, 4  ;;  %p2702_p13 = pnand %p2354_p12, %p2675_p6  ;;  %s2698_s5 = int_to_ptr.vmem [resolvable:$true] %s165_s5 }
  0x36   : > { %s2706_s15 = scalar_lea.sflag [#allocation6], %s150_s23  ;;  %s2440_s16 = scalar_lea.hbm %s2696_s4, 1024 }
  0x37   : > { %p2441_p0 = scmp.ne.s32.totalorder %s2696_s4, %s2440_s16  ;;  %p2442_p3 = pneg %p2702_p13 }
  0x38   : > { %s2445_s22 = scalar_lea.hbm %s3125_s1, 2048  ;;  %p2446_p9 = scmp.lt.u32.totalorder %s2696_s4, %s3125_s1 }
  0x39   : > { %p2443_p5 = pnand %p2442_p3, %p2441_p0  ;;  %p2447_p1 = scmp.lt.u32.totalorder %s2445_s22, %s2440_s16 }
  0x3a   : > { %p2449_p4 = scmp.lt.u32.totalorder %s2440_s16, %s2696_s4 }
  0x3b   : > { %p2444_p7 = pneg %p2443_p5  ;;  %p2448_p2 = por %p2447_p1, %p2446_p9 }
  0x3d   : > { %p2450_p6 = por %p2449_p4, %p2448_p2 }
  0x3f   : > { %p2451_p8 = pnand %p2450_p6, %p2444_p7 }
  0x41   : > { %2454 = shalt.err (!%p2451_p8)
}
  0x42   : > { %s2455_s23 = scalar_lea.vmem %s2698_s5, 1024  ;;  %s2561_s3 = smov [#allocation5]  }
  0x43   : > { %p2456_p12 = scmp.ne.s32.totalorder %s2698_s5, %s2455_s23  ;;  %s2460_s18 = sshll.u32 %s2561_s3, 4  ;;  %s2461_s18 = int_to_ptr.vmem [resolvable:$false] %s2460_s18 }
  0x44   : > { %s2462_s26 = scalar_lea.vmem %s2461_s18, 2048  ;;  %p2463_p5 = scmp.lt.s32.totalorder %s2698_s5, %s2461_s18 }
  0x45   : > { %p2458_p11 = pnand %p2456_p12, %p2442_p3  ;;  %p2464_p9 = scmp.lt.s32.totalorder %s2462_s26, %s2455_s23 }
  0x47   : > { %p2459_p0 = pneg %p2458_p11  ;;  %p2465_p1 = por %p2464_p9, %p2463_p5 }
  0x49   : > { %p2466_p2 = pnand %p2465_p1, %p2459_p0 }
  0x4b   : > { %2469 = shalt.err (!%p2466_p2)
}
  0x4c   : > { %2348 = dma.hbm_to_vmem [thread:$0]  (!%p2702_p13), %s2696_s4, 1024, %s2698_s5, %s2706_s15, %s2559_s6, %s2559_s6, %s2560_s7  }
  0x4d   : > { %p3141_p3 = scmp.ne.s32.totalorder %s3135_s21, 0 }
  0x4e   : > { %p3142_p7 = scmp.ne.s32.totalorder (!%p3141_p3), %s3131_s17, 0 }
  0x4f   : > { %177 = sbr.rel (%p3141_p3) target bundleno = 437 (0x1b5), region = 28 }
  0x56   : > { %2523 = dma.done.wait (%p3142_p7), [#allocation3], 256  }
  0x57   : > { %2525 = vsyncadd (%p3142_p7), [#allocation3], 4294967040  ;;  %s2744_s16 = sand.u32 1, %s2540_s10   ;;  %p3143_p13 = scmp.ne.s32.totalorder %s3133_s19, 0 }
  0x58   : > { %s2101_s8 = sshll.u32 %s2744_s16, 6  ;;  %s184_s27 = scalar_lea.sflag [#allocation6], %s2744_s16 }
  0x59   : > { %s2748_s22 = scalar_lea.vmem [#allocation5], %s2101_s8 }
  0x5a   : > { %2527 = dma.done.wait (%p3143_p13), %s184_s27, 1024  }
  0x5b   : > { %2529 = vsyncadd (%p3143_p13), %s184_s27, 4294966272  ;;  %vm222_vm0 = vcmask 130048   ;;  %v212_v0 = vld [vmem:[#allocation2] sm:$0xff]  ;;  %v213_v1 = vld [vmem:[#allocation2 + $0x8] sm:$0xff]  ;;  %vm1951_vm1 = vcmask 261120   ;;  %s2102_s17 = sshll.u32 %s2744_s16, 7 }
  0x5c   : > { %v214_v2 = vld [vmem:[%s2748_s22] sm:$0xff]  ;;  %v248_v3 = vand.u32 4294901760, %v212_v0  ;;  %v251_v4 = vand.u32 4294901760, %v213_v1  ;;  %v215_v6 = vld [vmem:[%s2748_s22 + $0x8] sm:$0xff]  ;;  %v216_v7 = vld [vmem:[%s2748_s22 + $0x10] sm:$0xff]  ;;  %s2908_s19 = scalar_lea.vmem [#allocation7], %s2102_s17 }
  0x5d   : > { %v224_v5 = vsel %vm222_vm0, %v214_v2, 0  ;;  %v217_v8 = vld [vmem:[%s2748_s22 + $0x18] sm:$0xff]  ;;  %v227_v10 = vsel %vm222_vm0, %v215_v6, 0  ;;  %v230_v11 = vsel %vm222_vm0, %v216_v7, 0  ;;  %v218_v13 = vld [vmem:[%s2748_s22 + $0x20] sm:$0xff]  ;;  %v219_v18 = vld [vmem:[%s2748_s22 + $0x28] sm:$0xff] }
  0x5e   : > { %v2759_v9 = vand.u32 4294901760, %v224_v5  ;;  %v233_v12 = vsel %vm222_vm0, %v217_v8, 0  ;;  %v2765_v14 = vpack.c.bf16 %v251_v4, %v248_v3  ;;  %v2767_v15 = vand.u32 4294901760, %v227_v10  ;;  %v220_v39 = vld [vmem:[%s2748_s22 + $0x30] sm:$0xff]  ;;  %v221_v48 = vld [vmem:[%s2748_s22 + $0x38] sm:$0xff]  ;;  %s2112_s21 = sshll.u32 %s2548_s12, 11 }
  0x5f   : > { %v2769_v16 = vand.u32 4294901760, %v230_v11  ;;  %v396_v17 = vsub.f32 %v212_v0, %v248_v3  ;;  %v403_v20 = vsub.f32 %v213_v1, %v251_v4  ;;  %v2775_v21 = vand.u32 4294901760, %v233_v12  ;;  %s1986_s6 = sshll.u32 %s2908_s19, 4  ;;  %s3069_s5 = scalar_lea.hbm %s3126_s2, %s2112_s21  ;;  %s3071_s6 = int_to_ptr.vmem [resolvable:$true] %s1986_s6 }
  0x60   : > { %v2773_v19 = vsub.f32 %v224_v5, %v2759_v9  ;;  %v236_v22 = vsel %vm222_vm0, %v218_v13, 0  ;;  %2282 = vmatprep.subr.bf16.mxu0 %v2765_v14  ;;  %2270 = vmatprep.subr.bf16.mxu1 %v2765_v14  ;;  %v2781_v23 = vsub.f32 %v227_v10, %v2767_v15  ;;  %v239_v30 = vsel %vm222_vm0, %v219_v18, 0  ;;  %s1969_s12 = scalar_lea.sflag [#allocation4], %s2744_s16  ;;  %s2470_s15 = scalar_lea.vmem %s3071_s6, 2048 }
  0x61   : > { %v2784_v24 = vsub.f32 %v230_v11, %v2769_v16  ;;  %v397_v25 = vand.u32 4294901760, %v396_v17  ;;  %v2786_v26 = vand.u32 4294901760, %v236_v22  ;;  %2284 = vmatpush3.bf16.msra.mxu0 %v2765_v14  ;;  %2272 = vmatpush3.bf16.msra.mxu1 %v2765_v14  ;;  %v404_v28 = vand.u32 4294901760, %v403_v20  ;;  %p2471_p4 = scmp.ne.s32.totalorder %s3071_s6, %s2470_s15  ;;  %s2564_s29 = smov [#allocation7]  }
  0x62   : > { %v316_v27 = vand.u32 4294901760, %v2773_v19  ;;  %v2792_v29 = vsub.f32 %v233_v12, %v2775_v21  ;;  %v326_v31 = vand.u32 4294901760, %v2781_v23  ;;  %v2807_v47 = vand.u32 4294901760, %v239_v30  ;;  %s2474_s30 = sshll.u32 %s2564_s29, 4  ;;  %s2475_s30 = int_to_ptr.vmem [resolvable:$false] %s2474_s30 }
  0x63   : > { %v336_v32 = vand.u32 4294901760, %v2784_v24  ;;  %v398_v33 = vsub.f32 %v396_v17, %v397_v25  ;;  %v2798_v34 = vsub.f32 %v236_v22, %v2786_v26  ;;  %v405_v36 = vsub.f32 %v403_v20, %v404_v28  ;;  %p2472_p6 = pnand %p2471_p4, %p2681_p10  ;;  %s2476_s23 = scalar_lea.vmem %s2475_s30, 4096 }
  0x64   : > { %2225 = vmatprep.mubr.f32.mxu0 %v316_v27  ;;  %v317_v35 = vsub.f32 %v2773_v19, %v316_v27  ;;  %v346_v37 = vand.u32 4294901760, %v2792_v29  ;;  %v2285_v38 = vpack.c.bf16 %v404_v28, %v397_v25  ;;  %v327_v40 = vsub.f32 %v2781_v23, %v326_v31  ;;  %p2477_p12 = scmp.lt.s32.totalorder %s3071_s6, %s2475_s30  ;;  %p2478_p11 = scmp.lt.s32.totalorder %s2476_s23, %s2470_s15 }
  0x65   : > { %2226 = vmatmul.mubr.f32.vlgmr.msra.gmra.mrb[0].mxu0 %v326_v31  ;;  %v399_v41 = vand.u32 4294901760, %v398_v33  ;;  %v337_v42 = vsub.f32 %v2784_v24, %v336_v32  ;;  %v356_v43 = vand.u32 4294901760, %v2798_v34  ;;  %v406_v45 = vand.u32 4294901760, %v405_v36  ;;  %p2473_p8 = pneg %p2472_p6 }
  0x66   : > { %v318_v44 = vand.u32 4294901760, %v317_v35  ;;  %2228 = vmatprep.mubr.f32.mxu0 %v336_v32  ;;  %2286 = vmatprep.subr.bf16.mxu0 %v2285_v38  ;;  %v347_v46 = vsub.f32 %v2792_v29, %v346_v37  ;;  %v328_v49 = vand.u32 4294901760, %v327_v40  ;;  %v242_v52 = vsel %vm222_vm0, %v220_v39, 0  ;;  %p2479_p0 = por %p2478_p11, %p2477_p12 }
  0x67   : > { %2288 = vmatpush3.bf16.msra.mxu0 %v2285_v38  ;;  %v338_v50 = vand.u32 4294901760, %v337_v42  ;;  %v357_v51 = vsub.f32 %v2798_v34, %v356_v43  ;;  %v2273_v53 = vpack.c.bf16 %v406_v45, %v399_v41  ;;  %v2813_v54 = vsub.f32 %v239_v30, %v2807_v47 }
  0x68   : > { %2177 = vmatprep.mubr.f32.mxu1 %v318_v44  ;;  %v374_v55 = vand.u32 4294901760, %v242_v52  ;;  %2290 = vmatprep.subr.bf16.mxu0 %v2765_v14  ;;  %v348_v56 = vand.u32 4294901760, %v347_v46  ;;  %v245_v57 = vsel %vm222_vm0, %v221_v48, 0  ;;  %v2277_v58 = vpack.c.bf16 %v403_v20, %v396_v17  ;;  %p2480_p5 = pnand %p2479_p0, %p2473_p8 }
  0x69   : > { %2178 = vmatmul.mubr.f32.vlgmr.msra.gmra.mrb[0].mxu1 %v328_v49  ;;  %2229 = vmatmul.mubr.f32.gmra.mrb[2].mxu0 %v346_v37  ;;  %v366_v59 = vand.u32 4294901760, %v2813_v54  ;;  %v358_v60 = vand.u32 4294901760, %v357_v51  ;;  %v384_v62 = vand.u32 4294901760, %v245_v57  ;;  %v2562_v8 = vmov 1966171168  }
  0x6a   : > { %2274 = vmatprep.subr.bf16.mxu1 %v2273_v53  ;;  %2180 = vmatprep.mubr.f32.mxu1 %v338_v50  ;;  %v375_v61 = vsub.f32 %v242_v52, %v374_v55  ;;  %v1019_v10 = vlaneseq }
  0x6b   : > { %2276 = vmatpush3.bf16.msra.mxu1 %v2273_v53  ;;  %2231 = vmatprep.mubr.f32.mxu0 %v356_v43  ;;  %v367_v0 = vsub.f32 %v2813_v54, %v366_v59  ;;  %v385_v1 = vsub.f32 %v245_v57, %v384_v62 }
  0x6c   : > { %v376_v63 = vand.u32 4294901760, %v375_v61  ;;  %2278 = vmatprep.subr.bf16.mxu1 %v2277_v58  ;;  %v1020_v12 = vshrl.u32 %v1019_v10, 7 }
  0x6d   : > { %2181 = vmatmul.mubr.f32.gmra.mrb[2].mxu1 %v348_v56  ;;  %2232 = vmatmul.mubr.f32.gmra.mrb[4].mxu0 %v366_v59  ;;  %v368_v2 = vand.u32 4294901760, %v367_v0  ;;  %v386_v3 = vand.u32 4294901760, %v385_v1 }
  0x6e   : > { %2183 = vmatprep.mubr.f32.mxu1 %v358_v60  ;;  %2234 = vmatprep.mubr.f32.mxu0 %v376_v63  ;;  %v377_v4 = vsub.f32 %v375_v61, %v376_v63  ;;  %v2847_v27 = vsub.s32 0, %v1020_v12 }
  0x6f   : > { %v387_v6 = vsub.f32 %v385_v1, %v386_v3 }
  0x70   : > { %v378_v5 = vand.u32 4294901760, %v377_v4 }
  0x71   : > { %2184 = vmatmul.mubr.f32.gmra.mrb[4].mxu1 %v368_v2  ;;  %2235 = vmatmul.mubr.f32.gmra.mrb[6].mxu0 %v386_v3  ;;  %v388_v7 = vand.u32 4294901760, %v387_v6 }
  0x72   : > { %2186 = vmatprep.mubr.f32.mxu1 %v378_v5  ;;  %2241 = vmatprep.mubr.f32.mxu0 %v2759_v9 }
  0x75   : > { %2187 = vmatmul.mubr.f32.gmra.mrb[6].mxu1 %v388_v7  ;;  %2242 = vmatmul.mubr.f32.vlgmr.msra.gmra.mrb[0].mxu0 %v2767_v15 }
  0x76   : > { %2193 = vmatprep.mubr.f32.mxu1 %v2759_v9  ;;  %2244 = vmatprep.mubr.f32.mxu0 %v2769_v16 }
  0x77   : > { %2292 = vmatpush3.bf16.msra.mxu0 %v2765_v14  ;;  %v2563_v14 = vmov 1983009808  }
  0x79   : > { %2194 = vmatmul.mubr.f32.vlgmr.msra.gmra.mrb[0].mxu1 %v2767_v15  ;;  %2245 = vmatmul.mubr.f32.gmra.mrb[2].mxu0 %v2775_v21 }
  0x7a   : > { %2280 = vmatpush3.bf16.msra.mxu1 %v2277_v58  ;;  %2196 = vmatprep.mubr.f32.mxu1 %v2769_v16 }
  0x7b   : > { %2247 = vmatprep.mubr.f32.mxu0 %v2786_v26 }
  0x7d   : > { %2197 = vmatmul.mubr.f32.gmra.mrb[2].mxu1 %v2775_v21  ;;  %2248 = vmatmul.mubr.f32.gmra.mrb[4].mxu0 %v2807_v47 }
  0x7e   : > { %2199 = vmatprep.mubr.f32.mxu1 %v2786_v26  ;;  %2250 = vmatprep.mubr.f32.mxu0 %v374_v55 }
  0x81   : > { %2200 = vmatmul.mubr.f32.gmra.mrb[4].mxu1 %v2807_v47  ;;  %2251 = vmatmul.mubr.f32.gmra.mrb[6].mxu0 %v384_v62 }
  0x82   : > { %2202 = vmatprep.mubr.f32.mxu1 %v374_v55  ;;  %2257 = vmatprep.mubr.f32.mxu0 %v2759_v9  ;;  %v1017_v9 = vunpack.c.l.s4 %v2562_v8 }
  0x84   : > { %v1018_v11 = vunpack.c.0.s8 %v1017_v9 }
  0x85   : > { %2203 = vmatmul.mubr.f32.gmra.mrb[6].mxu1 %v384_v62  ;;  %2258 = vmatmul.mubr.f32.vlgmr.msra.gmra.mrb[0].mxu0 %v2767_v15  ;;  %v1666_v15 = vunpack.c.l.s4 %v2563_v14 }
  0x86   : > { %2209 = vmatprep.mubr.f32.mxu1 %v2773_v19  ;;  %2260 = vmatprep.mubr.f32.mxu0 %v2769_v16  ;;  %v2844_v17 = vsub.s32 %v1018_v11, %v1020_v12 }
  0x87   : > { %v1667_v19 = vunpack.c.0.s8 %v1666_v15 }
  0x89   : > { %2210 = vmatmul.mubr.f32.vlgmr.msra.gmra.mrb[0].mxu1 %v2781_v23  ;;  %2261 = vmatmul.mubr.f32.gmra.mrb[2].mxu0 %v2775_v21  ;;  %v2849_v28 = vsub.s32 %v1667_v19, %v1020_v12 }
  0x8a   : > { %2212 = vmatprep.mubr.f32.mxu1 %v2784_v24  ;;  %2263 = vmatprep.mubr.f32.mxu0 %v2786_v26 }
  0x8d   : > { %2213 = vmatmul.mubr.f32.gmra.mrb[2].mxu1 %v2792_v29  ;;  %2264 = vmatmul.mubr.f32.gmra.mrb[4].mxu0 %v2807_v47 }
  0x8e   : > { %2215 = vmatprep.mubr.f32.mxu1 %v2798_v34  ;;  %2266 = vmatprep.mubr.f32.mxu0 %v374_v55 }
  0x91   : > { %2216 = vmatmul.mubr.f32.gmra.mrb[4].mxu1 %v2813_v54  ;;  %2267 = vmatmul.mubr.f32.gmra.mrb[6].mxu0 %v384_v62 }
  0x92   : > { %2218 = vmatprep.mubr.f32.mxu1 %v375_v61 }
  0x95   : > { %2219 = vmatmul.mubr.f32.gmra.mrb[6].mxu1 %v385_v1 }
 0x158   : > { %v2259_v13 = vpop.f32.mrb[0].mxu0 }
 0x159   : > { %v961_v16 = vpop.f32.mrb[1].mxu0 }
 0x15c   : > { %v2211_v18 = vpop.f32.mrb[0].mxu1  ;;  %v2262_v20 = vpop.f32.mrb[2].mxu0 }
 0x15d   : > { %v2293_v21 = vadd.f32 %v2259_v13, %v2211_v18  ;;  %v589_v22 = vpop.f32.mrb[1].mxu1  ;;  %v973_v23 = vpop.f32.mrb[3].mxu0 }
 0x15e   : > { %v2294_v24 = vadd.f32 %v961_v16, %v589_v22 }
 0x15f   : > { %v1064_v25 = vcombine.high %v2293_v21, %v2293_v21  ;;  %v1071_v26 = vrot.slane %v2293_v21, %v2844_v17 }
 0x160   : > { %v1015_v29 = vcombine.high %v2294_v24, %v2294_v24  ;;  %v1022_v30 = vrot.slane %v2294_v24, %v2844_v17  ;;  %v2214_v31 = vpop.f32.mrb[2].mxu1  ;;  %v2852_v32 = vpop.f32.mrb[4].mxu0 }
 0x161   : > { %v1078_v33 = vrot.slane %v1064_v25, %v2844_v17  ;;  %v1079_v34 = vcombine.high %v1071_v26, %v1071_v26  ;;  %v1087_v35 = vrot.slane %v1071_v26, %v2844_v17  ;;  %v2856_v36 = vadd.f32 %v2262_v20, %v2214_v31  ;;  %v603_v37 = vpop.f32.mrb[3].mxu1  ;;  %v2858_v38 = vpop.f32.mrb[5].mxu0 }
 0x162   : > { %v1029_v39 = vrot.slane %v1015_v29, %v2844_v17  ;;  %v1030_v40 = vcombine.high %v1022_v30, %v1022_v30  ;;  %v1038_v41 = vrot.slane %v1022_v30, %v2844_v17  ;;  %v2862_v42 = vadd.f32 %v973_v23, %v603_v37 }
 0x163   : > { %v1080_v43 = vcombine.high %v1078_v33, %v1078_v33  ;;  %v1094_v44 = vrot.slane %v1078_v33, %v2844_v17  ;;  %v1101_v45 = vrot.slane %v1079_v34, %v2844_v17  ;;  %v1109_v46 = vcombine.high %v1087_v35, %v1087_v35 }
 0x164   : > { %v1442_v47 = vrot.slane %v1087_v35, %v2847_v27  ;;  %v1031_v48 = vcombine.high %v1029_v39, %v1029_v39  ;;  %v1045_v49 = vrot.slane %v1029_v39, %v2844_v17  ;;  %v1052_v50 = vrot.slane %v1030_v40, %v2844_v17  ;;  %v2869_v51 = vpop.f32.mrb[4].mxu1  ;;  %v2871_v52 = vpop.f32.mrb[6].mxu0 }
 0x165   : > { %v1108_v53 = vrot.slane %v1080_v43, %v2844_v17  ;;  %v1110_v54 = vcombine.high %v1094_v44, %v1094_v44  ;;  %v1111_v55 = vcombine.high %v1101_v45, %v1101_v45  ;;  %v1446_v56 = vrot.slane %v1101_v45, %v2847_v27  ;;  %v2875_v57 = vpop.f32.mrb[5].mxu1  ;;  %v2877_v58 = vpop.f32.mrb[7].mxu0 }
 0x166   : > { %v1450_v59 = vrot.slane %v1109_v46, %v2847_v27  ;;  %v1458_v60 = vrot.slane %v1094_v44, %v2847_v27  ;;  %v1059_v61 = vrot.slane %v1031_v48, %v2844_v17  ;;  %v1060_v62 = vcombine.high %v1038_v41, %v1038_v41 }
 0x167   : > { %v1112_v63 = vcombine.high %v1108_v53, %v1108_v53  ;;  %v1454_v0 = vrot.slane %v1111_v55, %v2847_v27  ;;  %v1462_v1 = vrot.slane %v1108_v53, %v2847_v27  ;;  %v1466_v2 = vrot.slane %v1110_v54, %v2847_v27 }
 0x168   : > { %v1697_v3 = vcombine.low %v1442_v47, %v1446_v56  ;;  %v1061_v4 = vcombine.high %v1045_v49, %v1045_v49  ;;  %v1062_v5 = vcombine.high %v1052_v50, %v1052_v50  ;;  %v1063_v6 = vcombine.high %v1059_v61, %v1059_v61  ;;  %v2885_v7 = vpop.f32.mrb[6].mxu1 }
 0x169   : > { %v1470_v8 = vrot.slane %v1112_v63, %v2847_v27  ;;  %v1698_v9 = vcombine.low %v1450_v59, %v1454_v0  ;;  %v1714_v10 = vcombine.low %v1458_v60, %v1462_v1  ;;  %v1410_v11 = vrot.slane %v1038_v41, %v2847_v27  ;;  %v2890_v12 = vpop.f32.mrb[7].mxu1 }
 0x16a   : > { %v1705_v13 = vrot.slane %v1697_v3, %v2849_v28  ;;  %v1414_v14 = vrot.slane %v1052_v50, %v2847_v27  ;;  %v1418_v15 = vrot.slane %v1060_v62, %v2847_v27  ;;  %v1422_v16 = vrot.slane %v1062_v5, %v2847_v27 }
 0x16b   : > { %v1712_v18 = vrot.slane %v1698_v9, %v2849_v28  ;;  %v1715_v19 = vcombine.low %v1466_v2, %v1470_v8  ;;  %v1722_v20 = vrot.slane %v1714_v10, %v2849_v28  ;;  %v1426_v21 = vrot.slane %v1045_v49, %v2847_v27 }
 0x16c   : > { %v1430_v22 = vrot.slane %v1059_v61, %v2847_v27  ;;  %v1434_v23 = vrot.slane %v1061_v4, %v2847_v27  ;;  %v1438_v24 = vrot.slane %v1063_v6, %v2847_v27  ;;  %v1663_v25 = vcombine.low %v1410_v11, %v1414_v14 }
 0x16d   : > { %v1713_v26 = vcombine.low %v1705_v13, %v1712_v18  ;;  %v1729_v29 = vrot.slane %v1715_v19, %v2849_v28  ;;  %v1664_v30 = vcombine.low %v1418_v15, %v1422_v16  ;;  %v1162_v31 = vcombine.high %v2856_v36, %v2856_v36 }
 0x16e   : > { %v1671_v33 = vrot.slane %v1663_v25, %v2849_v28  ;;  %v1680_v34 = vcombine.low %v1426_v21, %v1430_v22  ;;  %v1681_v35 = vcombine.low %v1434_v23, %v1438_v24  ;;  %v1169_v37 = vrot.slane %v2856_v36, %v2844_v17 }
 0x16f   : > { %v1730_v39 = vcombine.low %v1722_v20, %v1729_v29  ;;  %1954 = vst.msk [vmem:[%s2908_s19 + $0x10] sm:$0xff] %vm1951_vm1, %v1713_v26  ;;  %v1678_v40 = vrot.slane %v1664_v30, %v2849_v28  ;;  %v1176_v41 = vrot.slane %v1162_v31, %v2844_v17  ;;  %v1113_v43 = vcombine.high %v2862_v42, %v2862_v42 }
 0x170   : > { %v1688_v44 = vrot.slane %v1680_v34, %v2849_v28  ;;  %v1695_v45 = vrot.slane %v1681_v35, %v2849_v28  ;;  %v1177_v36 = vcombine.high %v1169_v37, %v1169_v37  ;;  %v1185_v46 = vrot.slane %v1169_v37, %v2844_v17 }
 0x171   : > { %1955 = vst.msk [vmem:[%s2908_s19 + $0x18] sm:$0xff] %vm1951_vm1, %v1730_v39  ;;  %v1679_v47 = vcombine.low %v1671_v33, %v1678_v40  ;;  %v1178_v48 = vcombine.high %v1176_v41, %v1176_v41  ;;  %v1192_v49 = vrot.slane %v1176_v41, %v2844_v17  ;;  %v1120_v50 = vrot.slane %v2862_v42, %v2844_v17 }
 0x172   : > { %v1696_v53 = vcombine.low %v1688_v44, %v1695_v45  ;;  %v1199_v54 = vrot.slane %v1177_v36, %v2844_v17  ;;  %v1207_v55 = vcombine.high %v1185_v46, %v1185_v46  ;;  %v1506_v56 = vrot.slane %v1185_v46, %v2847_v27 }
 0x173   : > { %1952 = vst.msk [vmem:[%s2908_s19] sm:$0xff] %vm1951_vm1, %v1679_v47  ;;  %v1206_v59 = vrot.slane %v1178_v48, %v2844_v17  ;;  %v1208_v60 = vcombine.high %v1192_v49, %v1192_v49  ;;  %v1522_v61 = vrot.slane %v1192_v49, %v2847_v27  ;;  %v1127_v62 = vrot.slane %v1113_v43, %v2844_v17 }
 0x174   : > { %1953 = vst.msk [vmem:[%s2908_s19 + $0x8] sm:$0xff] %vm1951_vm1, %v1696_v53  ;;  %v1209_v63 = vcombine.high %v1199_v54, %v1199_v54  ;;  %v1510_v42 = vrot.slane %v1199_v54, %v2847_v27  ;;  %v1514_v0 = vrot.slane %v1207_v55, %v2847_v27  ;;  %v1128_v1 = vcombine.high %v1120_v50, %v1120_v50 }
 0x175   : > { %v1210_v2 = vcombine.high %v1206_v59, %v1206_v59  ;;  %v1526_v3 = vrot.slane %v1206_v59, %v2847_v27  ;;  %v1530_v4 = vrot.slane %v1208_v60, %v2847_v27  ;;  %v1129_v5 = vcombine.high %v1127_v62, %v1127_v62 }
 0x176   : > { %v1518_v6 = vrot.slane %v1209_v63, %v2847_v27  ;;  %v1765_v8 = vcombine.low %v1506_v56, %v1510_v42  ;;  %v1136_v9 = vrot.slane %v1120_v50, %v2844_v17  ;;  %v1143_v10 = vrot.slane %v1127_v62, %v2844_v17 }
 0x177   : > { %v1534_v11 = vrot.slane %v1210_v2, %v2847_v27  ;;  %v1782_v13 = vcombine.low %v1522_v61, %v1526_v3  ;;  %v1150_v14 = vrot.slane %v1128_v1, %v2844_v17  ;;  %v1157_v15 = vrot.slane %v1129_v5, %v2844_v17 }
 0x178   : > { %v1766_v16 = vcombine.low %v1514_v0, %v1518_v6  ;;  %v1773_v18 = vrot.slane %v1765_v8, %v2849_v28  ;;  %v1158_v19 = vcombine.high %v1136_v9, %v1136_v9  ;;  %v1159_v20 = vcombine.high %v1143_v10, %v1143_v10 }
 0x179   : > { %v1783_v21 = vcombine.low %v1530_v4, %v1534_v11  ;;  %v1790_v22 = vrot.slane %v1782_v13, %v2849_v28  ;;  %v1160_v23 = vcombine.high %v1150_v14, %v1150_v14  ;;  %v1161_v24 = vcombine.high %v1157_v15, %v1157_v15 }
 0x17a   : > { %v1780_v25 = vrot.slane %v1766_v16, %v2849_v28  ;;  %v1474_v26 = vrot.slane %v1136_v9, %v2847_v27  ;;  %v1478_v29 = vrot.slane %v1150_v14, %v2847_v27  ;;  %v1482_v30 = vrot.slane %v1158_v19, %v2847_v27 }
 0x17b   : > { %v1797_v31 = vrot.slane %v1783_v21, %v2849_v28  ;;  %v1486_v33 = vrot.slane %v1160_v23, %v2847_v27  ;;  %v1490_v34 = vrot.slane %v1143_v10, %v2847_v27  ;;  %v1494_v35 = vrot.slane %v1157_v15, %v2847_v27 }
 0x17c   : > { %v1781_v37 = vcombine.low %v1773_v18, %v1780_v25  ;;  %v1498_v39 = vrot.slane %v1159_v20, %v2847_v27  ;;  %v1502_v40 = vrot.slane %v1161_v24, %v2847_v27  ;;  %v1731_v41 = vcombine.low %v1474_v26, %v1478_v29 }
 0x17d   : > { %v1798_v43 = vcombine.low %v1790_v22, %v1797_v31  ;;  %v1732_v44 = vcombine.low %v1482_v30, %v1486_v33  ;;  %v1748_v45 = vcombine.low %v1490_v34, %v1494_v35  ;;  %v2297_v36 = vadd.f32 %v2852_v32, %v2869_v51 }
 0x17e   : > { %1958 = vst.msk [vmem:[%s2908_s19 + $0x30] sm:$0xff] %vm1951_vm1, %v1781_v37  ;;  %v1739_v46 = vrot.slane %v1731_v41, %v2849_v28  ;;  %v1749_v47 = vcombine.low %v1498_v39, %v1502_v40  ;;  %v2298_v48 = vadd.f32 %v2858_v38, %v2875_v57  ;;  %v2964_v49 = vadd.f32 %v2871_v52, %v2885_v7 }
 0x17f   : > { %1959 = vst.msk [vmem:[%s2908_s19 + $0x38] sm:$0xff] %vm1951_vm1, %v1798_v43  ;;  %v1746_v50 = vrot.slane %v1732_v44, %v2849_v28  ;;  %v1756_v53 = vrot.slane %v1748_v45, %v2849_v28  ;;  %v1260_v32 = vcombine.high %v2297_v36, %v2297_v36  ;;  %v1267_v51 = vrot.slane %v2297_v36, %v2844_v17 }
 0x180   : > { %v1763_v54 = vrot.slane %v1749_v47, %v2849_v28  ;;  %v1211_v55 = vcombine.high %v2298_v48, %v2298_v48  ;;  %v1218_v38 = vrot.slane %v2298_v48, %v2844_v17  ;;  %v1358_v52 = vcombine.high %v2964_v49, %v2964_v49 }
 0x181   : > { %v1747_v57 = vcombine.low %v1739_v46, %v1746_v50  ;;  %v1274_v7 = vrot.slane %v1260_v32, %v2844_v17  ;;  %v1275_v56 = vcombine.high %v1267_v51, %v1267_v51  ;;  %v1283_v59 = vrot.slane %v1267_v51, %v2844_v17 }
 0x182   : > { %v1764_v60 = vcombine.low %v1756_v53, %v1763_v54  ;;  %v1225_v61 = vrot.slane %v1211_v55, %v2844_v17  ;;  %v1226_v62 = vcombine.high %v1218_v38, %v1218_v38  ;;  %v1234_v63 = vrot.slane %v1218_v38, %v2844_v17 }
 0x183   : > { %1956 = vst.msk [vmem:[%s2908_s19 + $0x20] sm:$0xff] %vm1951_vm1, %v1747_v57  ;;  %v1276_v42 = vcombine.high %v1274_v7, %v1274_v7  ;;  %v1290_v0 = vrot.slane %v1274_v7, %v2844_v17  ;;  %v1297_v1 = vrot.slane %v1275_v56, %v2844_v17  ;;  %v1305_v2 = vcombine.high %v1283_v59, %v1283_v59 }
 0x184   : > { %1957 = vst.msk [vmem:[%s2908_s19 + $0x28] sm:$0xff] %vm1951_vm1, %v1764_v60  ;;  %v1570_v3 = vrot.slane %v1283_v59, %v2847_v27  ;;  %v1227_v4 = vcombine.high %v1225_v61, %v1225_v61  ;;  %v1241_v5 = vrot.slane %v1225_v61, %v2844_v17  ;;  %v1248_v6 = vrot.slane %v1226_v62, %v2844_v17 }
 0x185   : > { %v1304_v8 = vrot.slane %v1276_v42, %v2844_v17  ;;  %v1306_v9 = vcombine.high %v1290_v0, %v1290_v0  ;;  %v1307_v10 = vcombine.high %v1297_v1, %v1297_v1  ;;  %v1574_v11 = vrot.slane %v1297_v1, %v2847_v27 }
 0x186   : > { %v1578_v13 = vrot.slane %v1305_v2, %v2847_v27  ;;  %v1586_v14 = vrot.slane %v1290_v0, %v2847_v27  ;;  %v1255_v15 = vrot.slane %v1227_v4, %v2844_v17  ;;  %v1256_v16 = vcombine.high %v1234_v63, %v1234_v63 }
 0x187   : > { %v1308_v18 = vcombine.high %v1304_v8, %v1304_v8  ;;  %v1582_v19 = vrot.slane %v1307_v10, %v2847_v27  ;;  %v1590_v20 = vrot.slane %v1304_v8, %v2847_v27  ;;  %v1594_v21 = vrot.slane %v1306_v9, %v2847_v27 }
 0x188   : > { %v1833_v22 = vcombine.low %v1570_v3, %v1574_v11  ;;  %v1257_v23 = vcombine.high %v1241_v5, %v1241_v5  ;;  %v1258_v24 = vcombine.high %v1248_v6, %v1248_v6  ;;  %v1259_v25 = vcombine.high %v1255_v15, %v1255_v15 }
 0x189   : > { %v1598_v26 = vrot.slane %v1308_v18, %v2847_v27  ;;  %v1834_v29 = vcombine.low %v1578_v13, %v1582_v19  ;;  %v1850_v30 = vcombine.low %v1586_v14, %v1590_v20  ;;  %v1538_v31 = vrot.slane %v1234_v63, %v2847_v27 }
 0x18a   : > { %v1841_v33 = vrot.slane %v1833_v22, %v2849_v28  ;;  %v1542_v34 = vrot.slane %v1248_v6, %v2847_v27  ;;  %v1546_v35 = vrot.slane %v1256_v16, %v2847_v27  ;;  %v1550_v37 = vrot.slane %v1258_v24, %v2847_v27 }
 0x18b   : > { %v1848_v39 = vrot.slane %v1834_v29, %v2849_v28  ;;  %v1851_v40 = vcombine.low %v1594_v21, %v1598_v26  ;;  %v1858_v41 = vrot.slane %v1850_v30, %v2849_v28  ;;  %v1554_v43 = vrot.slane %v1241_v5, %v2847_v27 }
 0x18c   : > { %v1558_v44 = vrot.slane %v1255_v15, %v2847_v27  ;;  %v1562_v45 = vrot.slane %v1257_v23, %v2847_v27  ;;  %v1566_v36 = vrot.slane %v1259_v25, %v2847_v27  ;;  %v1799_v46 = vcombine.low %v1538_v31, %v1542_v34 }
 0x18d   : > { %v1849_v47 = vcombine.low %v1841_v33, %v1848_v39  ;;  %v1865_v48 = vrot.slane %v1851_v40, %v2849_v28  ;;  %v1800_v50 = vcombine.low %v1546_v35, %v1550_v37  ;;  %v1365_v53 = vrot.slane %v2964_v49, %v2844_v17 }
 0x18e   : > { %v1807_v32 = vrot.slane %v1799_v46, %v2849_v28  ;;  %v1816_v51 = vcombine.low %v1554_v43, %v1558_v44  ;;  %v1817_v54 = vcombine.low %v1562_v45, %v1566_v36  ;;  %v1372_v55 = vrot.slane %v1358_v52, %v2844_v17 }
 0x18f   : > { %v1866_v38 = vcombine.low %v1858_v41, %v1865_v48  ;;  %1962 = vst.msk [vmem:[%s2908_s19 + $0x50] sm:$0xff] %vm1951_vm1, %v1849_v47  ;;  %v1814_v57 = vrot.slane %v1800_v50, %v2849_v28  ;;  %v1373_v7 = vcombine.high %v1365_v53, %v1365_v53  ;;  %v1381_v56 = vrot.slane %v1365_v53, %v2844_v17 }
 0x190   : > { %v1824_v59 = vrot.slane %v1816_v51, %v2849_v28  ;;  %v1831_v49 = vrot.slane %v1817_v54, %v2849_v28  ;;  %v1374_v60 = vcombine.high %v1372_v55, %v1372_v55  ;;  %v1388_v61 = vrot.slane %v1372_v55, %v2844_v17 }
 0x191   : > { %1963 = vst.msk [vmem:[%s2908_s19 + $0x58] sm:$0xff] %vm1951_vm1, %v1866_v38  ;;  %v1815_v52 = vcombine.low %v1807_v32, %v1814_v57  ;;  %v1395_v62 = vrot.slane %v1373_v7, %v2844_v17  ;;  %v1403_v63 = vcombine.high %v1381_v56, %v1381_v56  ;;  %v1634_v3 = vrot.slane %v1381_v56, %v2847_v27 }
 0x192   : > { %v1832_v42 = vcombine.low %v1824_v59, %v1831_v49  ;;  %v1402_v0 = vrot.slane %v1374_v60, %v2844_v17  ;;  %v1404_v1 = vcombine.high %v1388_v61, %v1388_v61  ;;  %v2300_v5 = vadd.f32 %v2877_v58, %v2890_v12 }
 0x193   : > { %1960 = vst.msk [vmem:[%s2908_s19 + $0x40] sm:$0xff] %vm1951_vm1, %v1815_v52  ;;  %v1405_v2 = vcombine.high %v1395_v62, %v1395_v62  ;;  %v1638_v4 = vrot.slane %v1395_v62, %v2847_v27  ;;  %v1642_v8 = vrot.slane %v1403_v63, %v2847_v27  ;;  %v1650_v9 = vrot.slane %v1388_v61, %v2847_v27 }
 0x194   : > { %1961 = vst.msk [vmem:[%s2908_s19 + $0x48] sm:$0xff] %vm1951_vm1, %v1832_v42  ;;  %v1406_v6 = vcombine.high %v1402_v0, %v1402_v0  ;;  %v1654_v10 = vrot.slane %v1402_v0, %v2847_v27  ;;  %v1309_v14 = vcombine.high %v2300_v5, %v2300_v5  ;;  %v1316_v15 = vrot.slane %v2300_v5, %v2844_v17 }
 0x195   : > { %v1646_v11 = vrot.slane %v1405_v2, %v2847_v27  ;;  %v1901_v13 = vcombine.low %v1634_v3, %v1638_v4  ;;  %v1658_v16 = vrot.slane %v1404_v1, %v2847_v27 }
 0x196   : > { %v1662_v18 = vrot.slane %v1406_v6, %v2847_v27  ;;  %v1918_v58 = vcombine.low %v1650_v9, %v1654_v10  ;;  %v1323_v19 = vrot.slane %v1309_v14, %v2844_v17  ;;  %v1324_v20 = vcombine.high %v1316_v15, %v1316_v15 }
 0x197   : > { %v1902_v12 = vcombine.low %v1642_v8, %v1646_v11  ;;  %v1909_v21 = vrot.slane %v1901_v13, %v2849_v28  ;;  %v1332_v23 = vrot.slane %v1316_v15, %v2844_v17 }
 0x198   : > { %v1919_v22 = vcombine.low %v1658_v16, %v1662_v18  ;;  %v1325_v25 = vcombine.high %v1323_v19, %v1323_v19  ;;  %v1339_v26 = vrot.slane %v1323_v19, %v2844_v17  ;;  %v1346_v29 = vrot.slane %v1324_v20, %v2844_v17 }
 0x199   : > { %v1916_v24 = vrot.slane %v1902_v12, %v2849_v28  ;;  %v1926_v30 = vrot.slane %v1918_v58, %v2849_v28  ;;  %v1354_v33 = vcombine.high %v1332_v23, %v1332_v23  ;;  %v1602_v41 = vrot.slane %v1332_v23, %v2847_v27 }
 0x19a   : > { %v1933_v31 = vrot.slane %v1919_v22, %v2849_v28  ;;  %v1353_v35 = vrot.slane %v1325_v25, %v2844_v17  ;;  %v1355_v37 = vcombine.high %v1339_v26, %v1339_v26  ;;  %v1356_v39 = vcombine.high %v1346_v29, %v1346_v29 }
 0x19b   : > { %v1917_v34 = vcombine.low %v1909_v21, %v1916_v24  ;;  %v1606_v43 = vrot.slane %v1346_v29, %v2847_v27  ;;  %v1610_v44 = vrot.slane %v1354_v33, %v2847_v27  ;;  %v1618_v46 = vrot.slane %v1339_v26, %v2847_v27 }
 0x19c   : > { %v1934_v40 = vcombine.low %v1926_v30, %v1933_v31  ;;  %v1357_v45 = vcombine.high %v1353_v35, %v1353_v35  ;;  %v1614_v36 = vrot.slane %v1356_v39, %v2847_v27  ;;  %v1622_v17 = vrot.slane %v1353_v35, %v2847_v27 }
 0x19d   : > { %1966 = vst.msk [vmem:[%s2908_s19 + $0x70] sm:$0xff] %vm1951_vm1, %v1917_v34  ;;  %v1867_v47 = vcombine.low %v1602_v41, %v1606_v43  ;;  %v1626_v48 = vrot.slane %v1355_v37, %v2847_v27 }
 0x19e   : > { %1967 = vst.msk [vmem:[%s2908_s19 + $0x78] sm:$0xff] %vm1951_vm1, %v1934_v40  ;;  %v1630_v50 = vrot.slane %v1357_v45, %v2847_v27  ;;  %v1868_v53 = vcombine.low %v1610_v44, %v1614_v36  ;;  %v1884_v32 = vcombine.low %v1618_v46, %v1622_v17 }
 0x19f   : > { %v1875_v51 = vrot.slane %v1867_v47, %v2849_v28 }
 0x1a0   : > { %v1882_v54 = vrot.slane %v1868_v53, %v2849_v28  ;;  %v1885_v55 = vcombine.low %v1626_v48, %v1630_v50  ;;  %v1892_v57 = vrot.slane %v1884_v32, %v2849_v28 }
 0x1a2   : > { %v1883_v38 = vcombine.low %v1875_v51, %v1882_v54  ;;  %v1899_v7 = vrot.slane %v1885_v55, %v2849_v28 }
 0x1a4   : > { %v1900_v27 = vcombine.low %v1892_v57, %v1899_v7  ;;  %1964 = vst.msk [vmem:[%s2908_s19 + $0x60] sm:$0xff] %vm1951_vm1, %v1883_v38 }
 0x1a6   : > { %1965 = vst.msk [vmem:[%s2908_s19 + $0x68] sm:$0xff] %vm1951_vm1, %v1900_v27 }
 0x1a7   : > { %2483 = shalt.err (!%p2480_p5)
}
 0x1a8   : > { %s2484_s3 = scalar_lea.hbm %s3069_s5, 2048  ;;  %s2488_s8 = scalar_lea.hbm %s3126_s2, 4096 }
 0x1a9   : > { %p2485_p9 = scmp.ne.s32.totalorder %s3069_s5, %s2484_s3  ;;  %p2489_p3 = scmp.lt.u32.totalorder %s3069_s5, %s3126_s2 }
 0x1aa   : > { %p2490_p7 = scmp.lt.u32.totalorder %s2488_s8, %s2484_s3  ;;  %p2492_p4 = scmp.lt.u32.totalorder %s2484_s3, %s3069_s5 }
 0x1ab   : > { %p2486_p1 = pnand %p2485_p9, %p2681_p10 }
 0x1ac   : > { %p2491_p13 = por %p2490_p7, %p2489_p3 }
 0x1ad   : > { %p2487_p2 = pneg %p2486_p1 }
 0x1ae   : > { %p2493_p6 = por %p2492_p4, %p2491_p13 }
 0x1b0   : > { %p2494_p8 = pnand %p2493_p6, %p2487_p2 }
 0x1b2   : > { %2497 = shalt.err (!%p2494_p8)
}
 0x1b3   : > { %s2565_s17 = smov 128   ;;  %s2566_s19 = smov 8  }
 0x1b4   : > { %2339 = dma.vmem_to_hbm [thread:$0]  (%p2681_p10), %s3071_s6, 2048, %s3069_s5, %s1969_s12, %s2565_s17, %s2565_s17, %s2566_s19  }
 0x1b5 PF: > { %s2001_s21 = sand.u32 1, %s2536_s9   ;;  %p3144_p12 = scmp.ne.s32.totalorder %s3134_s20, 0 }
 0x1b6   : > { %p3145_p11 = scmp.ge.s32.totalorder %s2556_s14, 2  ;;  %s2002_s7 = scalar_lea.sflag [#allocation4], %s2001_s21 }
 0x1b8   : > { %p2350_p0 = pnand %p3145_p11, %p3144_p12 }
 0x1ba   : > { %2531 = dma.done.wait (!%p2350_p0), %s2002_s7, 2048  }
 0x1bb   : > { %2533 = vsyncadd (!%p2350_p0), %s2002_s7, 4294965248  ;;  %s19_s14 = sadd.s32 1, %s2556_s14   ;;  %s3146_s9 = smov %s2540_s10 }
 0x1bc   : > { %p16_p5 = scmp.ge.s32.totalorder %s19_s14, 4   ;;  %s3147_s10 = smov %s2544_s11 }
 0x1bd   : > { %s3148_s11 = smov %s2690_s28  ;;  %s3149_s12 = smov %s2552_s13 }
 0x1be   : > { %s3150_s13 = smov %s3152_s25  ;;  %18 = sbr.rel (!%p16_p5) target bundleno = 7 (0x7), region = 78 }
 0x1c5   :  { %2007 = vsyncpa [#allocation3], 1 }
 0x1c6   :  { %2009 = vsyncpa [#allocation3 + $0x1], 1 }
 0x1c7   :  { %2010 = vsyncpa [#allocation6], 1 }
 0x1c8   :  { %2012 = vsyncpa [#allocation6 + $0x1], 1 }
 0x1c9   :  { %2013 = vsyncpa [#allocation4], 1 }
 0x1ca   :  { %2015 = vsyncpa [#allocation4 + $0x1], 1 }

</bundles_post_ra>
